<compile_context>
chip_gen: v5e
topology: v5e:2x2
jax: 0.10.0
libtpu: 0.0.40
codegen_flags: <defaults>
</compile_context>

<pallas_src>
import functools

import jax
import jax.numpy as jnp
from jax.experimental import pallas as pl
from jax.experimental.pallas import tpu as pltpu


def _fused_affine_kernel(coef_ref, xt_ref, o_ref):
    # coef_ref: SMEM f32[3] = [w_eff0, w_eff1, b_eff]
    # xt_ref:   VMEM f32[2, 8, TILE_C]  (features, sublanes, lane-columns)
    # o_ref:    VMEM f32[8, TILE_C]     (fully dense vregs, unmasked vst)
    w0 = coef_ref[0]
    w1 = coef_ref[1]
    b = coef_ref[2]
    o_ref[...] = xt_ref[0] * w0 + xt_ref[1] * w1 + b


@functools.partial(
    jax.jit, static_argnames=("max_tile_cols", "allow_xla_fast_path"))
def circle_model0_forward(x, w1, b1, w2, b2, *, max_tile_cols=65536,
                          allow_xla_fast_path=False):
    """x: [N, 2] f32 -> logits [N, 1] f32, identical to layer2(layer1(x))."""
    n = x.shape[0]

    # Exact algebraic fusion of the two linears (valid because there is no
    # activation between layer1 and layer2 in CircleModel0.forward).
    # TODO(synk): if the source model ever adds a ReLU between the layers,
    # this fusion (and the kernel) must be revisited.
    w_eff = jnp.dot(w1, w2, precision=jax.lax.Precision.HIGHEST)        # [2, 1]
    b_eff = jnp.dot(b1, w2, precision=jax.lax.Precision.HIGHEST) + b2   # [1, 1]

    # Small-batch fast path: for tiny inputs (the real dataset is N=1000,
    # ~8 KiB) the pallas_call dispatch + layout ops dominate wall clock; let
    # XLA fuse the single affine map instead.  Off by default so the Pallas
    # path is always exercised unless the caller opts in.
    if allow_xla_fast_path and n * 2 * 4 <= (64 << 10):
        return (jnp.dot(x.astype(jnp.float32), w_eff.astype(jnp.float32))
                + b_eff.astype(jnp.float32))

    coef = jnp.concatenate(
        [w_eff.reshape(-1), b_eff.reshape(-1)]).astype(jnp.float32)     # [3]

    # ---- Tile / grid selection (all static under jit) ----
    # Each lane-column covers 8 batch rows (sublane fold).
    max_tile_cols = max(128, (int(max_tile_cols) // 128) * 128)
    cols = pl.cdiv(max(n, 1), 8)
    cols = pl.cdiv(cols, 128) * 128            # lane dim multiple of 128
    if cols <= max_tile_cols:
        steps = 1
        tile_c = cols
    else:
        steps = pl.cdiv(cols, max_tile_cols)   # >= 2 here
        steps = steps + (steps % 2)            # even -> balanced v7x megacore
        tile_c = pl.cdiv(pl.cdiv(cols, steps), 128) * 128
    cols_pad = steps * tile_c
    n_pad = 8 * cols_pad

    # Lane/sublane-dense layout: batch folded to [2, 8, cols_pad].  Under jit
    # the transpose + pad + reshape + astype fuse into one layout pass.
    xt = jnp.transpose(x).astype(jnp.float32)                           # [2, N]
    if n_pad != n:
        xt = jnp.pad(xt, ((0, 0), (0, n_pad - n)))
    xt = xt.reshape(2, 8, cols_pad)

    # VMEM budget: double-buffered input tile [2,8,tile_c] + output tile
    # [8,tile_c], f32, plus 1 MiB headroom.  Default tile -> ~13 MiB total:
    # within v5e's 16 MiB scoped default and far below v7x's 64 MiB physical.
    in_tile_bytes = 2 * 8 * tile_c * 4
    out_tile_bytes = 8 * tile_c * 4
    vmem_bytes = 2 * (in_tile_bytes + out_tile_bytes) + (1 << 20)

    out = pl.pallas_call(
        _fused_affine_kernel,
        out_shape=jax.ShapeDtypeStruct((8, cols_pad), jnp.float32),
        grid=(steps,),
        in_specs=[
            pl.BlockSpec(memory_space=pltpu.MemorySpace.SMEM),   # fused coefs
            pl.BlockSpec((2, 8, tile_c), lambda i: (0, 0, i)),   # x tile
        ],
        out_specs=pl.BlockSpec((8, tile_c), lambda i: (0, i)),
        compiler_params=pltpu.CompilerParams(
            dimension_semantics=("parallel",),
            vmem_limit_bytes=vmem_bytes,
        ),
    )(coef, xt)

    # Flatten order of [8, cols_pad] matches the fold order, so the first n
    # entries are exactly the original batch rows; padded tail is sliced off.
    return out.reshape(n_pad, 1)[:n]


def init_params(key):
    """Deterministic init mimicking PyTorch nn.Linear: U(-1/sqrt(fan_in), +)."""
    k1, k2, k3, k4 = jax.random.split(key, 4)
    in1, out1 = 2, 5
    in2, out2 = 5, 1
    bound1 = 1.0 / jnp.sqrt(jnp.float32(in1))
    bound2 = 1.0 / jnp.sqrt(jnp.float32(in2))
    w1 = jax.random.uniform(k1, (in1, out1), jnp.float32, -bound1, bound1)
    b1 = jax.random.uniform(k2, (1, out1), jnp.float32, -bound1, bound1)
    w2 = jax.random.uniform(k3, (in2, out2), jnp.float32, -bound2, bound2)
    b2 = jax.random.uniform(k4, (1, out2), jnp.float32, -bound2, bound2)
    return w1, b1, w2, b2


if __name__ == "__main__":
    key = jax.random.PRNGKey(0)
    kx, kp = jax.random.split(key)
    w1, b1, w2, b2 = init_params(kp)

    def ref_fwd(x):
        h = jnp.dot(x, w1, precision=jax.lax.Precision.HIGHEST) + b1
        return jnp.dot(h, w2, precision=jax.lax.Precision.HIGHEST) + b2

    # Small-shape check (single tile, single grid step).
    batch = 8
    x_small = jax.random.normal(kx, (batch, 2), jnp.float32)
    logits = circle_model0_forward(x_small, w1, b1, w2, b2)
    jax.block_until_ready(logits)
    assert logits.shape == (batch, 1)
    assert jnp.allclose(logits, ref_fwd(x_small), atol=1e-4, rtol=1e-4), \
        "small-batch mismatch vs reference"

    # Dataset-sized check (make_circles n_samples=1000): still a single tile.
    n_data = 1000
    x_data = jax.random.normal(jax.random.PRNGKey(1), (n_data, 2), jnp.float32)
    logits_data = circle_model0_forward(x_data, w1, b1, w2, b2)
    jax.block_until_ready(logits_data)
    assert logits_data.shape == (n_data, 1)
    assert jnp.allclose(logits_data, ref_fwd(x_data), atol=1e-4, rtol=1e-4), \
        "dataset-size mismatch vs reference"

    # Multi-tile check: small max_tile_cols forces a multi-step, even-sized
    # grid (exercises folding, padding, and the parallel row grid).
    n_big = 5000
    x_big = jax.random.normal(jax.random.PRNGKey(2), (n_big, 2), jnp.float32)
    logits_big = circle_model0_forward(x_big, w1, b1, w2, b2,
                                       max_tile_cols=128)
    jax.block_until_ready(logits_big)
    assert logits_big.shape == (n_big, 1)
    assert jnp.allclose(logits_big, ref_fwd(x_big), atol=1e-4, rtol=1e-4), \
        "multi-tile mismatch vs reference"

    # Optional pure-XLA fast path for tiny batches (dispatch-overhead regime).
    logits_fast = circle_model0_forward(x_small, w1, b1, w2, b2,
                                        allow_xla_fast_path=True)
    jax.block_until_ready(logits_fast)
    assert jnp.allclose(logits_fast, ref_fwd(x_small), atol=1e-4, rtol=1e-4), \
        "fast-path mismatch vs reference"

    print("KERNEL_OK")
</pallas_src>

<mosaic_0001>
module attributes {stable_mosaic.version = 11 : i64} {
  func.func @_fused_affine_kernel(%arg0: i32, %arg1: memref<3xf32, #tpu.memory_space<smem>>, %arg2: memref<2x8x128xf32, #tpu.memory_space<vmem>>, %arg3: memref<8x128xf32, #tpu.memory_space<vmem>>) attributes {dimension_semantics = [#tpu.dimension_semantics<parallel>], iteration_bounds = array<i64: 1>, scalar_prefetch = 0 : i64, scratch_operands = 0 : i64, tpu.core_type = #tpu.core_type<tc>, window_params = [{transform_indices = @transform_0, window_bounds = array<i64: 3>}, {transform_indices = @transform_1, window_bounds = array<i64: 2, 8, 128>}, {transform_indices = @transform_2, window_bounds = array<i64: 8, 128>}]} {
    %c0 = arith.constant 0 : index
    %0 = memref.load %arg1[%c0] : memref<3xf32, #tpu.memory_space<smem>>
    %c1 = arith.constant 1 : index
    %1 = memref.load %arg1[%c1] : memref<3xf32, #tpu.memory_space<smem>>
    %c2 = arith.constant 2 : index
    %2 = memref.load %arg1[%c2] : memref<3xf32, #tpu.memory_space<smem>>
    %c0_0 = arith.constant 0 : index
    %c0_1 = arith.constant 0 : index
    %c0_2 = arith.constant 0 : index
    %3 = vector.load %arg2[%c0_0, %c0_1, %c0_2] : memref<2x8x128xf32, #tpu.memory_space<vmem>>, vector<1x8x128xf32>
    %4 = vector.shape_cast %3 : vector<1x8x128xf32> to vector<8x128xf32>
    %5 = vector.broadcast %0 : f32 to vector<8x128xf32>
    %6 = arith.mulf %4, %5 : vector<8x128xf32>
    %c1_3 = arith.constant 1 : index
    %c0_4 = arith.constant 0 : index
    %c0_5 = arith.constant 0 : index
    %7 = vector.load %arg2[%c1_3, %c0_4, %c0_5] : memref<2x8x128xf32, #tpu.memory_space<vmem>>, vector<1x8x128xf32>
    %8 = vector.shape_cast %7 : vector<1x8x128xf32> to vector<8x128xf32>
    %9 = vector.broadcast %1 : f32 to vector<8x128xf32>
    %10 = arith.mulf %8, %9 : vector<8x128xf32>
    %11 = arith.addf %6, %10 : vector<8x128xf32>
    %12 = vector.broadcast %2 : f32 to vector<8x128xf32>
    %13 = arith.addf %11, %12 : vector<8x128xf32>
    %c0_6 = arith.constant 0 : index
    %c0_7 = arith.constant 0 : index
    %14 = vector.load %arg3[%c0_6, %c0_7] : memref<8x128xf32, #tpu.memory_space<vmem>>, vector<8x128xf32>
    tpu.vector_store %arg3[%c0_6, %c0_7], %13 {strides = array<i32>} : memref<8x128xf32, #tpu.memory_space<vmem>>, vector<8x128xf32>,
    return
  }
  func.func @transform_0(%arg0: i32) -> i32 {
    %c0_i32 = arith.constant 0 : i32
    %c0_i32_0 = arith.constant 0 : i32
    return %c0_i32 : i32
  }
  func.func @transform_1(%arg0: i32) -> (i32, i32, i32) {
    %c0_i32 = arith.constant 0 : i32
    %c0_i32_0 = arith.constant 0 : i32
    %c0_i32_1 = arith.constant 0 : i32
    return %c0_i32, %c0_i32_0, %arg0 : i32, i32, i32
  }
  func.func @transform_2(%arg0: i32) -> (i32, i32) {
    %c0_i32 = arith.constant 0 : i32
    %c0_i32_0 = arith.constant 0 : i32
    return %c0_i32, %arg0 : i32, i32
  }
}

</mosaic_0001>

<bundles_post_ra>
// kernel: circle_model0_forward.1
= control target key start
LH: loop header
LB: loop body
LE: loop exit
PB: predicated region body
PF: predicated region fallthrough
CT: control target
= control target key end

     0   :  { %7 = vsyncpa [#allocation3], 0  ;;  %s61_s12 = smov [#allocation2]   ;;  %s89_s0 = inlined_call_operand.vmem [shape: f32[3], index: 0, kind: input, shape index: {}]   ;;  %s90_s1 = inlined_call_operand.vmem [shape: f32[2,8,128], index: 1, kind: input, shape index: {}]   ;;  %s91_s2 = inlined_call_operand.vmem [shape: f32[8,128], index: 2, kind: output, shape index: {}]  }
   0x1   :  { %s13_s11 = sshll.u32 %s89_s0, 4  ;;  %s14_s11 = int_to_ptr.vmem [resolvable:$true] %s13_s11 }
   0x2   :  { %16 = dma.vmem_to_smem %s14_s11, 16, %s61_s12, [#allocation3]  }
   0x3   :  { %59 = dma.done.wait [#allocation3], 16  }
   0x4   :  { %60 = vsyncadd [#allocation3], 4294967280 }
   0x5   :  { %23 = sfence }
   0x6   :  { %s24_s13 = sld [smem:[#allocation2]]  ;;  %v27_v0 = vld [vmem:[%s90_s1] sm:$0xff]  ;;  %v45_v1 = vld [vmem:[%s90_s1 + $0x8] sm:$0xff] }
   0x7   :  { %s43_s14 = sld [smem:[#allocation2 + $0x1]] }
   0x8   :  { %s44_s15 = sld [smem:[#allocation2 + $0x2]] }
   0xc   :  { %v28_v2 = vstv %s24_s13 }
   0xd   :  { %v29_v3 = vmul.f32 %v28_v2, %v27_v0  ;;  %v32_v4 = vstv %s43_s14 }
   0xe   :  { %v33_v5 = vmul.f32 %v45_v1, %v32_v4  ;;  %v35_v6 = vstv %s44_s15 }
  0x10   :  { %v34_v7 = vadd.f32 %v33_v5, %v29_v3 }
  0x12   :  { %v36_v8 = vadd.f32 %v35_v6, %v34_v7 }
  0x14   :  { %37 = vst [vmem:[%s91_s2] sm:$0xff] %v36_v8 }
  0x15   :  { %42 = vsyncpa [#allocation3], 1 }

</bundles_post_ra>
